<compile_context>
chip_gen: v7x
topology: tpu7x:2x2x1
jax: 0.10.0
libtpu: 0.0.40
codegen_flags: <defaults>
</compile_context>

<pallas_src>
import functools

import jax
import jax.numpy as jnp
from jax.experimental import pallas as pl
from jax.experimental.pallas import tpu as pltpu


def attention_kernel(x_ref, wq_ref, wk_ref, wv_ref, wo_ref, b_ref, o_ref, *,
                     heads, scale):
    # x block: (1, n, dim_pad) -> (n, dim_pad); cast MXU operand to bf16.
    x = x_ref[0].astype(jnp.bfloat16)
    xb = jnp.broadcast_to(x, (heads,) + x.shape)              # (h, n, dim_pad)

    # Head-batched QKV projections -> (h, n, d_head), f32 accumulation.
    q = jnp.einsum('hnd,hdk->hnk', xb, wq_ref[...],
                   preferred_element_type=jnp.float32)
    k = jnp.einsum('hnd,hdk->hnk', xb, wk_ref[...],
                   preferred_element_type=jnp.float32)
    v = jnp.einsum('hnd,hdk->hnk', xb, wv_ref[...],
                   preferred_element_type=jnp.float32)

    # Fold the softmax scale into q (n*d elements, not n*n), then bf16 for MXU.
    q = (q * scale).astype(jnp.bfloat16)
    k = k.astype(jnp.bfloat16)
    v = v.astype(jnp.bfloat16)

    # Scores: contract on the last dim of both operands (no materialized K^T).
    s = jnp.einsum('hqd,hkd->hqk', q, k,
                   preferred_element_type=jnp.float32)        # (h, n, n)

    # Numerically stable softmax in f32; reciprocal goes to the EUP slot.
    s = s - jnp.max(s, axis=-1, keepdims=True)
    e = jnp.exp(s)
    p = e * pl.reciprocal(jnp.sum(e, axis=-1, keepdims=True), approx=True)

    # Attention output per head, then the output projection applied per head
    # and reduced over heads (replaces concat + (n, inner) @ (inner, dim)).
    o_h = jnp.einsum('hqk,hkd->hqd', p.astype(jnp.bfloat16), v,
                     preferred_element_type=jnp.float32)      # (h, n, d_head)
    proj_h = jnp.einsum('hnd,hdo->hno', o_h.astype(jnp.bfloat16), wo_ref[...],
                        preferred_element_type=jnp.float32)   # (h, n, dim_pad)

    # Bias add (f32) and lane-dense store. Dropout p=0.0 -> identity.
    o_ref[0] = (jnp.sum(proj_h, axis=0) + b_ref[...]).astype(o_ref.dtype)


def attention_pallas(x, w_qkv, w_out, b_out, *, heads, dim_head, scale):
    b, n, dim = x.shape
    inner = heads * dim_head
    assert w_qkv.shape == (dim, 3 * inner)
    assert w_out.shape == (inner, dim)
    assert b_out.shape == (1, dim)

    # Pad the model dim up to a lane-dense multiple of 128 so all kernel loads
    # and (critically) output stores are unmasked full-lane accesses.
    dim_pad = ((dim + 127) // 128) * 128
    pad = dim_pad - dim

    # ---- layout plumbing (cheap, done once outside the kernel) ----
    x_p = jnp.pad(x, ((0, 0), (0, 0), (0, pad)))

    def head_split_in(w):
        # (dim, heads*dim_head) -> (heads, dim_pad, dim_head), bf16, zero-pad.
        w = w.reshape(dim, heads, dim_head).transpose(1, 0, 2)
        w = jnp.pad(w, ((0, 0), (0, pad), (0, 0)))
        return w.astype(jnp.bfloat16)

    wq, wk, wv = (head_split_in(w) for w in jnp.split(w_qkv, 3, axis=-1))
    # (inner, dim) -> (heads, dim_head, dim_pad), bf16.
    wo = jnp.pad(w_out.reshape(heads, dim_head, dim),
                 ((0, 0), (0, 0), (0, pad))).astype(jnp.bfloat16)
    bo = jnp.pad(b_out, ((0, 0), (0, pad)))                   # stays f32

    kernel = functools.partial(attention_kernel, heads=heads, scale=scale)

    out_p = pl.pallas_call(
        kernel,
        out_shape=jax.ShapeDtypeStruct((b, n, dim_pad), x.dtype),
        grid_spec=pltpu.PrefetchScalarGridSpec(
            num_scalar_prefetch=0,
            grid=(b,),
            in_specs=[
                pl.BlockSpec((1, n, dim_pad), lambda i: (i, 0, 0)),             # x
                pl.BlockSpec((heads, dim_pad, dim_head), lambda i: (0, 0, 0)),  # Wq
                pl.BlockSpec((heads, dim_pad, dim_head), lambda i: (0, 0, 0)),  # Wk
                pl.BlockSpec((heads, dim_pad, dim_head), lambda i: (0, 0, 0)),  # Wv
                pl.BlockSpec((heads, dim_head, dim_pad), lambda i: (0, 0, 0)),  # Wout
                pl.BlockSpec((1, dim_pad), lambda i: (0, 0)),                   # b_out
            ],
            out_specs=pl.BlockSpec((1, n, dim_pad), lambda i: (i, 0, 0)),
        ),
        compiler_params=pltpu.CompilerParams(
            dimension_semantics=("parallel",),   # b>=2 -> both TCs on v7x
        ),
    )(x_p, wq, wk, wv, wo, bo)

    return out_p[..., :dim]


def attention_ref(x, w_qkv, w_out, b_out, *, heads, dim_head, scale):
    """Pure-JAX f32 reference mirroring the PyTorch forward."""
    b, n, dim = x.shape
    inner = heads * dim_head
    qkv = x @ w_qkv                                            # (b, n, 3*inner)
    q, k, v = jnp.split(qkv, 3, axis=-1)

    def split_heads(t):
        return t.reshape(b, n, heads, dim_head).transpose(0, 2, 1, 3)

    q, k, v = map(split_heads, (q, k, v))
    dots = jnp.einsum("bhid,bhjd->bhij", q, k) * scale
    attn = jax.nn.softmax(dots, axis=-1)
    out = jnp.einsum("bhij,bhjd->bhid", attn, v)
    out = out.transpose(0, 2, 1, 3).reshape(b, n, inner)
    return out @ w_out + b_out


if __name__ == "__main__":
    # Small shapes consistent with the module's forward: x is (b, n, dim).
    B, N, DIM = 2, 8, 32
    HEADS, DIM_HEAD = 2, 16
    INNER = HEADS * DIM_HEAD
    SCALE = DIM_HEAD ** -0.5

    key = jax.random.PRNGKey(0)
    k_x, k_qkv, k_out, k_b = jax.random.split(key, 4)

    x = jax.random.normal(k_x, (B, N, DIM), dtype=jnp.float32)
    # Deterministic synthetic parameters, stored as (in, out) for x @ W.
    w_qkv = jax.random.normal(k_qkv, (DIM, 3 * INNER), dtype=jnp.float32) * 0.05
    w_out = jax.random.normal(k_out, (INNER, DIM), dtype=jnp.float32) * 0.05
    b_out = jax.random.normal(k_b, (1, DIM), dtype=jnp.float32) * 0.05

    out = attention_pallas(
        x, w_qkv, w_out, b_out, heads=HEADS, dim_head=DIM_HEAD, scale=SCALE
    )
    out = jax.block_until_ready(out)

    ref = attention_ref(
        x, w_qkv, w_out, b_out, heads=HEADS, dim_head=DIM_HEAD, scale=SCALE
    )
    assert out.shape == (B, N, DIM)
    # bf16 MXU operands + approx reciprocal -> relaxed (but tight for bf16) tol.
    assert jnp.allclose(out, ref, atol=2e-2, rtol=2e-2), (
        "mismatch vs reference; max abs err = "
        f"{float(jnp.max(jnp.abs(out - ref)))}"
    )

    print("KERNEL_OK")
</pallas_src>

<mosaic_0001>
module attributes {stable_mosaic.version = 11 : i64} {
  func.func @attention_kernel(%arg0: i32, %arg1: memref<1x8x128xf32, #tpu.memory_space<vmem>>, %arg2: memref<2x128x16xbf16, #tpu.memory_space<vmem>>, %arg3: memref<2x128x16xbf16, #tpu.memory_space<vmem>>, %arg4: memref<2x128x16xbf16, #tpu.memory_space<vmem>>, %arg5: memref<2x16x128xbf16, #tpu.memory_space<vmem>>, %arg6: memref<1x128xf32, #tpu.memory_space<vmem>>, %arg7: memref<1x8x128xf32, #tpu.memory_space<vmem>>) attributes {dimension_semantics = [#tpu.dimension_semantics<parallel>], iteration_bounds = array<i64: 2>, scalar_prefetch = 0 : i64, scratch_operands = 0 : i64, tpu.core_type = #tpu.core_type<tc>, window_params = [{transform_indices = @transform_0, window_bounds = array<i64: 1, 8, 128>}, {pipeline_mode = #tpu.pipeline_mode<synchronous>, transform_indices = @transform_1, window_bounds = array<i64: 2, 128, 16>}, {pipeline_mode = #tpu.pipeline_mode<synchronous>, transform_indices = @transform_2, window_bounds = array<i64: 2, 128, 16>}, {pipeline_mode = #tpu.pipeline_mode<synchronous>, transform_indices = @transform_3, window_bounds = array<i64: 2, 128, 16>}, {pipeline_mode = #tpu.pipeline_mode<synchronous>, transform_indices = @transform_4, window_bounds = array<i64: 2, 16, 128>}, {pipeline_mode = #tpu.pipeline_mode<synchronous>, transform_indices = @transform_5, window_bounds = array<i64: 1, 128>}, {transform_indices = @transform_6, window_bounds = array<i64: 1, 8, 128>}]} {
    %c0 = arith.constant 0 : index
    %c0_0 = arith.constant 0 : index
    %c0_1 = arith.constant 0 : index
    %0 = vector.load %arg1[%c0, %c0_0, %c0_1] : memref<1x8x128xf32, #tpu.memory_space<vmem>>, vector<1x8x128xf32>
    %1 = vector.shape_cast %0 : vector<1x8x128xf32> to vector<8x128xf32>
    %2 = arith.truncf %1 : vector<8x128xf32> to vector<8x128xbf16>
    %3 = vector.shape_cast %2 : vector<8x128xbf16> to vector<1x8x128xbf16>
    %4 = vector.broadcast %3 : vector<1x8x128xbf16> to vector<2x8x128xbf16>
    %c0_2 = arith.constant 0 : index
    %c0_3 = arith.constant 0 : index
    %c0_4 = arith.constant 0 : index
    %5 = vector.load %arg2[%c0_2, %c0_3, %c0_4] : memref<2x128x16xbf16, #tpu.memory_space<vmem>>, vector<2x128x16xbf16>
    "tpu.trace_start"() <{level = 10 : i32, message = "hnd,hdk->hnk"}> : () -> ()
    %cst = arith.constant dense<0.000000e+00> : vector<2x8x16xf32>
    %6 = tpu.matmul %4, %5, %cst {dimension_numbers = #tpu.dot_dimension_numbers<[2], [1], [1], [2], [0, 0, 0, 1, 1, 2], [0], [0]>} : vector<2x8x128xbf16>, vector<2x128x16xbf16>, vector<2x8x16xf32> -> vector<2x8x16xf32>
    "tpu.trace_stop"() : () -> ()
    %c0_5 = arith.constant 0 : index
    %c0_6 = arith.constant 0 : index
    %c0_7 = arith.constant 0 : index
    %7 = vector.load %arg3[%c0_5, %c0_6, %c0_7] : memref<2x128x16xbf16, #tpu.memory_space<vmem>>, vector<2x128x16xbf16>
    "tpu.trace_start"() <{level = 10 : i32, message = "hnd,hdk->hnk"}> : () -> ()
    %cst_8 = arith.constant dense<0.000000e+00> : vector<2x8x16xf32>
    %8 = tpu.matmul %4, %7, %cst_8 {dimension_numbers = #tpu.dot_dimension_numbers<[2], [1], [1], [2], [0, 0, 0, 1, 1, 2], [0], [0]>} : vector<2x8x128xbf16>, vector<2x128x16xbf16>, vector<2x8x16xf32> -> vector<2x8x16xf32>
    "tpu.trace_stop"() : () -> ()
    %c0_9 = arith.constant 0 : index
    %c0_10 = arith.constant 0 : index
    %c0_11 = arith.constant 0 : index
    %9 = vector.load %arg4[%c0_9, %c0_10, %c0_11] : memref<2x128x16xbf16, #tpu.memory_space<vmem>>, vector<2x128x16xbf16>
    "tpu.trace_start"() <{level = 10 : i32, message = "hnd,hdk->hnk"}> : () -> ()
    %cst_12 = arith.constant dense<0.000000e+00> : vector<2x8x16xf32>
    %10 = tpu.matmul %4, %9, %cst_12 {dimension_numbers = #tpu.dot_dimension_numbers<[2], [1], [1], [2], [0, 0, 0, 1, 1, 2], [0], [0]>} : vector<2x8x128xbf16>, vector<2x128x16xbf16>, vector<2x8x16xf32> -> vector<2x8x16xf32>
    "tpu.trace_stop"() : () -> ()
    %cst_13 = arith.constant 2.500000e-01 : f32
    %11 = vector.broadcast %cst_13 : f32 to vector<2x8x16xf32>
    %12 = arith.mulf %6, %11 : vector<2x8x16xf32>
    %13 = arith.truncf %12 : vector<2x8x16xf32> to vector<2x8x16xbf16>
    %14 = arith.truncf %8 : vector<2x8x16xf32> to vector<2x8x16xbf16>
    %15 = arith.truncf %10 : vector<2x8x16xf32> to vector<2x8x16xbf16>
    "tpu.trace_start"() <{level = 10 : i32, message = "hqd,hkd->hqk"}> : () -> ()
    %cst_14 = arith.constant dense<0.000000e+00> : vector<2x8x8xf32>
    %16 = tpu.matmul %13, %14, %cst_14 {dimension_numbers = #tpu.dot_dimension_numbers<[2], [2], [1], [1], [0, 0, 0, 1, 1, 1], [0], [0]>} : vector<2x8x16xbf16>, vector<2x8x16xbf16>, vector<2x8x8xf32> -> vector<2x8x8xf32>
    "tpu.trace_stop"() : () -> ()
    %cst_15 = arith.constant dense<0xFF800000> : vector<2x8xf32>
    %17 = vector.multi_reduction <maximumf>, %16, %cst_15 [2] : vector<2x8x8xf32> to vector<2x8xf32>
    %18 = vector.shape_cast %17 : vector<2x8xf32> to vector<2x8x1xf32>
    %19 = vector.broadcast %18 : vector<2x8x1xf32> to vector<2x8x8xf32>
    %20 = arith.subf %16, %19 : vector<2x8x8xf32>
    %21 = math.exp %20 : vector<2x8x8xf32>
    %cst_16 = arith.constant dense<0.000000e+00> : vector<2x8xf32>
    %22 = vector.multi_reduction <add>, %21, %cst_16 [2] : vector<2x8x8xf32> to vector<2x8xf32>
    %23 = vector.shape_cast %22 : vector<2x8xf32> to vector<2x8x1xf32>
    %24 = tpu.reciprocal %23 {approx = true} : vector<2x8x1xf32> -> vector<2x8x1xf32>
    %25 = vector.broadcast %24 : vector<2x8x1xf32> to vector<2x8x8xf32>
    %26 = arith.mulf %21, %25 : vector<2x8x8xf32>
    %27 = arith.truncf %26 : vector<2x8x8xf32> to vector<2x8x8xbf16>
    "tpu.trace_start"() <{level = 10 : i32, message = "hqk,hkd->hqd"}> : () -> ()
    %cst_17 = arith.constant dense<0.000000e+00> : vector<2x8x16xf32>
    %28 = tpu.matmul %27, %15, %cst_17 {dimension_numbers = #tpu.dot_dimension_numbers<[2], [1], [1], [2], [0, 0, 0, 1, 1, 2], [0], [0]>} : vector<2x8x8xbf16>, vector<2x8x16xbf16>, vector<2x8x16xf32> -> vector<2x8x16xf32>
    "tpu.trace_stop"() : () -> ()
    %29 = arith.truncf %28 : vector<2x8x16xf32> to vector<2x8x16xbf16>
    %c0_18 = arith.constant 0 : index
    %c0_19 = arith.constant 0 : index
    %c0_20 = arith.constant 0 : index
    %30 = vector.load %arg5[%c0_18, %c0_19, %c0_20] : memref<2x16x128xbf16, #tpu.memory_space<vmem>>, vector<2x16x128xbf16>
    "tpu.trace_start"() <{level = 10 : i32, message = "hnd,hdo->hno"}> : () -> ()
    %cst_21 = arith.constant dense<0.000000e+00> : vector<2x8x128xf32>
    %31 = tpu.matmul %29, %30, %cst_21 {dimension_numbers = #tpu.dot_dimension_numbers<[2], [1], [1], [2], [0, 0, 0, 1, 1, 2], [0], [0]>} : vector<2x8x16xbf16>, vector<2x16x128xbf16>, vector<2x8x128xf32> -> vector<2x8x128xf32>
    "tpu.trace_stop"() : () -> ()
    %cst_22 = arith.constant dense<0.000000e+00> : vector<8x128xf32>
    %32 = vector.multi_reduction <add>, %31, %cst_22 [0] : vector<2x8x128xf32> to vector<8x128xf32>
    %c0_23 = arith.constant 0 : index
    %c0_24 = arith.constant 0 : index
    %33 = vector.load %arg6[%c0_23, %c0_24] : memref<1x128xf32, #tpu.memory_space<vmem>>, vector<1x128xf32>
    %34 = vector.broadcast %33 : vector<1x128xf32> to vector<8x128xf32>
    %35 = arith.addf %32, %34 : vector<8x128xf32>
    %c0_25 = arith.constant 0 : index
    %c0_26 = arith.constant 0 : index
    %c0_27 = arith.constant 0 : index
    %36 = vector.load %arg7[%c0_25, %c0_26, %c0_27] : memref<1x8x128xf32, #tpu.memory_space<vmem>>, vector<1x8x128xf32>
    %37 = vector.shape_cast %36 : vector<1x8x128xf32> to vector<8x128xf32>
    %38 = vector.shape_cast %35 : vector<8x128xf32> to vector<1x8x128xf32>
    tpu.vector_store %arg7[%c0_25, %c0_26, %c0_27], %38 {strides = array<i32>} : memref<1x8x128xf32, #tpu.memory_space<vmem>>, vector<1x8x128xf32>,
    return
  }
  func.func @transform_0(%arg0: i32) -> (i32, i32, i32) {
    %c0_i32 = arith.constant 0 : i32
    %c0_i32_0 = arith.constant 0 : i32
    %c0_i32_1 = arith.constant 0 : i32
    return %arg0, %c0_i32, %c0_i32_0 : i32, i32, i32
  }
  func.func @transform_1(%arg0: i32) -> (i32, i32, i32) {
    %c0_i32 = arith.constant 0 : i32
    %c0_i32_0 = arith.constant 0 : i32
    %c0_i32_1 = arith.constant 0 : i32
    %c0_i32_2 = arith.constant 0 : i32
    return %c0_i32, %c0_i32_0, %c0_i32_1 : i32, i32, i32
  }
  func.func @transform_2(%arg0: i32) -> (i32, i32, i32) {
    %c0_i32 = arith.constant 0 : i32
    %c0_i32_0 = arith.constant 0 : i32
    %c0_i32_1 = arith.constant 0 : i32
    %c0_i32_2 = arith.constant 0 : i32
    return %c0_i32, %c0_i32_0, %c0_i32_1 : i32, i32, i32
  }
  func.func @transform_3(%arg0: i32) -> (i32, i32, i32) {
    %c0_i32 = arith.constant 0 : i32
    %c0_i32_0 = arith.constant 0 : i32
    %c0_i32_1 = arith.constant 0 : i32
    %c0_i32_2 = arith.constant 0 : i32
    return %c0_i32, %c0_i32_0, %c0_i32_1 : i32, i32, i32
  }
  func.func @transform_4(%arg0: i32) -> (i32, i32, i32) {
    %c0_i32 = arith.constant 0 : i32
    %c0_i32_0 = arith.constant 0 : i32
    %c0_i32_1 = arith.constant 0 : i32
    %c0_i32_2 = arith.constant 0 : i32
    return %c0_i32, %c0_i32_0, %c0_i32_1 : i32, i32, i32
  }
  func.func @transform_5(%arg0: i32) -> (i32, i32) {
    %c0_i32 = arith.constant 0 : i32
    %c0_i32_0 = arith.constant 0 : i32
    %c0_i32_1 = arith.constant 0 : i32
    return %c0_i32, %c0_i32_0 : i32, i32
  }
  func.func @transform_6(%arg0: i32) -> (i32, i32, i32) {
    %c0_i32 = arith.constant 0 : i32
    %c0_i32_0 = arith.constant 0 : i32
    %c0_i32_1 = arith.constant 0 : i32
    return %arg0, %c0_i32, %c0_i32_0 : i32, i32, i32
  }
}

</mosaic_0001>

<bundles_post_ra>
// kernel: tpu_custom_call.1
= control target key start
LH: loop header
LB: loop body
LE: loop exit
PB: predicated region body
PF: predicated region fallthrough
CT: control target
= control target key end

     0   :  { %11 = vsyncpa [#allocation3], 0  ;;  %s2121_s0 = inlined_call_operand.vmem [shape: f32[2,8,128], index: 0, kind: input, shape index: {}]   ;;  %s2122_s1 = inlined_call_operand.vmem [shape: bf16[2,128,16], index: 1, kind: input, shape index: {}]   ;;  %s2123_s2 = inlined_call_operand.vmem [shape: bf16[2,128,16], index: 2, kind: input, shape index: {}]   ;;  %s2124_s3 = inlined_call_operand.vmem [shape: bf16[2,128,16], index: 3, kind: input, shape index: {}]   ;;  %s2125_s4 = inlined_call_operand.vmem [shape: bf16[2,16,128], index: 4, kind: input, shape index: {}]   ;;  %s2126_s5 = inlined_call_operand.vmem [shape: f32[1,128], index: 5, kind: input, shape index: {}]   ;;  %s2127_s6 = inlined_call_operand.hbm [shape: f32[2,8,128], index: 6, kind: output, shape index: {}]  }
   0x1   :  { %13 = vsyncpa [#allocation3 + $0x1], 0  ;;  %s1770_s21 = smov 0   ;;  %s1772_s22 = smov 0  }
   0x2   :  { %s1774_s23 = smov 0   ;;  %s1776_s24 = smov 0  }
   0x3 LB: > { %s1791_s25 = sadd.s32 4294967295, %s1730_s24   ;;  %s1280_s26 = sadd.s32 4294967294, %s1730_s24   ;;  %s1730_s24 = sphi %s1776_s24, %s2133_s24   ;;  %s1726_s23 = sphi %s1774_s23, %s2132_s23   ;;  %s1722_s22 = sphi %s1772_s22, %s2131_s22   ;;  %s1718_s21 = sphi %s1770_s21, %s2130_s21  }
   0x4   : > { %s1795_s27 = sadd.s32 1, %s1730_s24   ;;  %s157_s28 = sadd.s32 1, %s1726_s23 }
   0x5   : > { %s154_s29 = ssub.s32 %s1730_s24, %s1795_s27  ;;  %p167_p0 = scmp.ne.s32.totalorder %s1726_s23, %s1722_s22 }
   0x6   : > { %p155_p1 = scmp.eq.s32.totalorder %s154_s29, 0  ;;  %p168_p2 = scmp.eq.s32.totalorder %s1791_s25, 1 }
   0x7   : > { %p173_p3 = scmp.ne.s32.totalorder %s1722_s22, %s1718_s21  ;;  %p174_p4 = scmp.eq.s32.totalorder %s1280_s26, 1 }
   0x8   : > { %s1806_s30 = scalar_select %p155_p1, %s1726_s23, %s157_s28  }
   0x9   : > { %p1808_p5 = por %p168_p2, %p167_p0  ;;  %p1812_p6 = por %p174_p4, %p173_p3 }
   0xa   : > { %p1283_p7 = scmp.ge.s32.totalorder %s1730_s24, 1  ;;  %p214_p8 = scmp.lt.s32.totalorder %s1730_s24, 3 }
   0xc   : > { %p215_p9 = pnand %p1283_p7, %p214_p8 }
   0xd   : > { %v1610_v0 = vld [vmem:[%s2122_s1] sm:$0xff] (!%p215_p9)   ;;  %v1732_v1 = vmov (!%p215_p9), 0.0   ;;  %v1612_v3 = vld [vmem:[%s2122_s1 + $0x8] sm:$0xff] (!%p215_p9)   ;;  %vm1733_vm0 = vmmov (!%p215_p9), 0   ;;  %v1614_v5 = vld [vmem:[%s2122_s1 + $0x10] sm:$0xff] (!%p215_p9)   ;;  %p243_p10 = scmp.lt.s32.totalorder (!%p215_p9), %s1791_s25, 1 }
   0xe   : > { %218 = sbr.rel (%p215_p9) target bundleno = 1276 (0x4fc), region = 44  ;;  %1413 = vmatprep.subr.bf16.mxu0 (!%p215_p9), %v1732_v1  ;;  %1433 = vmatprep.subr.bf16.mxu1 (!%p215_p9), %v1732_v1  ;;  %v1611_v2 = vld [vmem:[%s2122_s1 + $0x40] sm:$0xff] (!%p215_p9)   ;;  %v1613_v4 = vld [vmem:[%s2122_s1 + $0x48] sm:$0xff] (!%p215_p9)   ;;  %v1615_v6 = vld [vmem:[%s2122_s1 + $0x50] sm:$0xff] (!%p215_p9)   ;;  %vm882_vm1 = vcmask (!%p215_p9), 130048   ;;  %vm1003_vm2 = vcmask (!%p215_p9), 1043456  }
   0xf   : > { %1414 = vmatpush3.bf16.msra.mxu0 (!%p215_p9), %v1610_v0  ;;  %1429 = vmatprep.mubr.msk.bf16.mxu0 (!%p215_p9), %vm1733_vm0, %v1732_v1  ;;  %v1616_v7 = vld [vmem:[%s2122_s1 + $0x18] sm:$0xff] (!%p215_p9)   ;;  %v1618_v9 = vld [vmem:[%s2122_s1 + $0x20] sm:$0xff] (!%p215_p9)   ;;  %v1620_v11 = vld [vmem:[%s2122_s1 + $0x28] sm:$0xff] (!%p215_p9)   ;;  %vm975_vm3 = vcmask (!%p215_p9), 64512   ;;  %s240_s9 = sand.u32 (!%p215_p9), 1, %s1722_s22   ;;  %s1344_s13 = sshll.u32 (!%p215_p9), %s1791_s25, 7 }
  0x10   : > { %1434 = vmatpush3.bf16.msra.mxu1 (!%p215_p9), %v1611_v2  ;;  %1415 = vmatprep.subr.bf16.mxu0 (!%p215_p9), %v1732_v1  ;;  %v1617_v8 = vld [vmem:[%s2122_s1 + $0x58] sm:$0xff] (!%p215_p9)   ;;  %v1619_v10 = vld [vmem:[%s2122_s1 + $0x60] sm:$0xff] (!%p215_p9)   ;;  %v1621_v12 = vld [vmem:[%s2122_s1 + $0x68] sm:$0xff] (!%p215_p9)   ;;  %s1284_s10 = sshll.u32 (!%p215_p9), %s240_s9, 3  ;;  %s2079_s18 = scalar_lea.hbm (!%p215_p9), %s2127_s6, %s1344_s13 }
  0x11   : > { %1435 = vmatprep.subr.bf16.mxu1 (!%p215_p9), %v1732_v1  ;;  %1449 = vmatprep.mubr.msk.bf16.mxu1 (!%p215_p9), %vm1733_vm0, %v1732_v1  ;;  %v1622_v13 = vld [vmem:[%s2122_s1 + $0x30] sm:$0xff] (!%p215_p9)   ;;  %v1624_v15 = vld [vmem:[%s2122_s1 + $0x38] sm:$0xff] (!%p215_p9)   ;;  %v1626_v19 = vld [vmem:[%s2123_s2] sm:$0xff] (!%p215_p9)   ;;  %s1734_s20 = smov (!%p215_p9), [#allocation2]  }
  0x12   : > { %v1623_v14 = vld [vmem:[%s2122_s1 + $0x70] sm:$0xff] (!%p215_p9)   ;;  %v1625_v17 = vld [vmem:[%s2122_s1 + $0x78] sm:$0xff] (!%p215_p9)   ;;  %v1627_v20 = vld [vmem:[%s2123_s2 + $0x40] sm:$0xff] (!%p215_p9)   ;;  %s1672_s26 = sshll.u32 (!%p215_p9), %s1734_s20, 4  ;;  %s1673_s26 = int_to_ptr.vmem [resolvable:$false] %s1672_s26 }
  0x13   : > { %1416 = vmatpush3.bf16.msra.mxu0 (!%p215_p9), %v1612_v3  ;;  %v1628_v21 = vld [vmem:[%s2123_s2 + $0x8] sm:$0xff] (!%p215_p9)   ;;  %v1630_v23 = vld [vmem:[%s2123_s2 + $0x10] sm:$0xff] (!%p215_p9)   ;;  %v1632_v25 = vld [vmem:[%s2123_s2 + $0x18] sm:$0xff] (!%p215_p9)   ;;  %s1674_s28 = scalar_lea.vmem (!%p215_p9), %s1673_s26, 256 }
  0x14   : > { %1436 = vmatpush3.bf16.msra.mxu1 (!%p215_p9), %v1613_v4  ;;  %1417 = vmatprep.subr.bf16.mxu0 (!%p215_p9), %v1732_v1  ;;  %v1629_v22 = vld [vmem:[%s2123_s2 + $0x48] sm:$0xff] (!%p215_p9)   ;;  %v1631_v24 = vld [vmem:[%s2123_s2 + $0x50] sm:$0xff] (!%p215_p9)   ;;  %v1633_v26 = vld [vmem:[%s2123_s2 + $0x58] sm:$0xff] (!%p215_p9)  }
  0x15   : > { %1437 = vmatprep.subr.bf16.mxu1 %v1732_v1  ;;  %s244_s14 = scalar_select %p243_p10, %s1791_s25, 1  ;;  %v1634_v27 = vld [vmem:[%s2123_s2 + $0x20] sm:$0xff]   ;;  %v1636_v29 = vld [vmem:[%s2123_s2 + $0x28] sm:$0xff]   ;;  %v1638_v31 = vld [vmem:[%s2123_s2 + $0x30] sm:$0xff]  }
  0x16   : > { %v1635_v28 = vld [vmem:[%s2123_s2 + $0x60] sm:$0xff]   ;;  %v1637_v30 = vld [vmem:[%s2123_s2 + $0x68] sm:$0xff]   ;;  %v1639_v32 = vld [vmem:[%s2123_s2 + $0x70] sm:$0xff]  }
  0x17   : > { %1418 = vmatpush3.bf16.msra.mxu0 %v1614_v5  ;;  %s1285_s19 = sshll.u32 %s244_s14, 3  ;;  %v1640_v33 = vld [vmem:[%s2123_s2 + $0x38] sm:$0xff]   ;;  %v1642_v35 = vld [vmem:[%s2124_s3] sm:$0xff]   ;;  %v1644_v37 = vld [vmem:[%s2124_s3 + $0x8] sm:$0xff]   ;;  %s242_s14 = scalar_lea.vmem [#allocation2], %s1284_s10 }
  0x18   : > { %1438 = vmatpush3.bf16.msra.mxu1 %v1615_v6  ;;  %1419 = vmatprep.subr.bf16.mxu0 %v1732_v1  ;;  %s246_s11 = scalar_lea.vmem %s2121_s0, %s1285_s19  ;;  %v1641_v34 = vld [vmem:[%s2123_s2 + $0x78] sm:$0xff]   ;;  %v1643_v36 = vld [vmem:[%s2124_s3 + $0x40] sm:$0xff]   ;;  %v1645_v38 = vld [vmem:[%s2124_s3 + $0x48] sm:$0xff]   ;;  %s1221_s15 = sshll.u32 %s242_s14, 4  ;;  %s2081_s15 = int_to_ptr.vmem [resolvable:$true] %s1221_s15 }
  0x19   : > { %1439 = vmatprep.subr.bf16.mxu1 %v1732_v1  ;;  %v248_v16 = vld [vmem:[%s246_s11] sm:$0xff]  ;;  %v1646_v39 = vld [vmem:[%s2124_s3 + $0x10] sm:$0xff]   ;;  %v1648_v41 = vld [vmem:[%s2124_s3 + $0x18] sm:$0xff]   ;;  %s1208_s19 = scalar_lea.sflag [#allocation3], %s240_s9  ;;  %s1668_s25 = scalar_lea.vmem %s2081_s15, 128 }
  0x1a   : > { %v1891_v18 = vpack.c.bf16 %v248_v16, %v248_v16  ;;  %v1647_v40 = vld [vmem:[%s2124_s3 + $0x50] sm:$0xff]   ;;  %v1649_v42 = vld [vmem:[%s2124_s3 + $0x58] sm:$0xff]   ;;  %v1650_v43 = vld [vmem:[%s2124_s3 + $0x20] sm:$0xff]   ;;  %p1669_p11 = scmp.ne.s32.totalorder %s2081_s15, %s1668_s25  ;;  %p1675_p0 = scmp.lt.s32.totalorder %s2081_s15, %s1673_s26 }
  0x1b   : > { %1420 = vmatpush3.bf16.msra.mxu0 %v1616_v7  ;;  %v1651_v44 = vld [vmem:[%s2124_s3 + $0x60] sm:$0xff]   ;;  %v1652_v45 = vld [vmem:[%s2124_s3 + $0x28] sm:$0xff]   ;;  %v1654_v47 = vld [vmem:[%s2124_s3 + $0x30] sm:$0xff]   ;;  %p1676_p1 = scmp.lt.s32.totalorder %s1674_s28, %s1668_s25 }
  0x1c   : > { %1440 = vmatpush3.bf16.msra.mxu1 %v1617_v8  ;;  %1421 = vmatprep.subr.bf16.mxu0 %v1732_v1  ;;  %v1653_v46 = vld [vmem:[%s2124_s3 + $0x68] sm:$0xff]   ;;  %v1655_v48 = vld [vmem:[%s2124_s3 + $0x70] sm:$0xff]   ;;  %v1656_v49 = vld [vmem:[%s2124_s3 + $0x38] sm:$0xff]   ;;  %p1670_p12 = pnand %p1669_p11, %p1808_p5 }
  0x1d   : > { %1441 = vmatprep.subr.bf16.mxu1 %v1732_v1  ;;  %v1657_v50 = vld [vmem:[%s2124_s3 + $0x78] sm:$0xff]   ;;  %p1677_p2 = por %p1676_p1, %p1675_p0 }
  0x1e   : > { %p1671_p13 = pneg %p1670_p12 }
  0x1f   : > { %1422 = vmatpush3.bf16.msra.mxu0 %v1618_v9 }
  0x20   : > { %1442 = vmatpush3.bf16.msra.mxu1 %v1619_v10  ;;  %1423 = vmatprep.subr.bf16.mxu0 %v1732_v1  ;;  %p1678_p3 = pnand %p1677_p2, %p1671_p13 }
  0x21   : > { %1443 = vmatprep.subr.bf16.mxu1 %v1732_v1 }
  0x23   : > { %1424 = vmatpush3.bf16.msra.mxu0 %v1620_v11 }
  0x24   : > { %1444 = vmatpush3.bf16.msra.mxu1 %v1621_v12  ;;  %1425 = vmatprep.subr.bf16.mxu0 %v1732_v1 }
  0x25   : > { %1445 = vmatprep.subr.bf16.mxu1 %v1732_v1 }
  0x27   : > { %1426 = vmatpush3.bf16.msra.mxu0 %v1622_v13 }
  0x28   : > { %1446 = vmatpush3.bf16.msra.mxu1 %v1623_v14  ;;  %1427 = vmatprep.subr.bf16.mxu0 %v1732_v1 }
  0x29   : > { %1447 = vmatprep.subr.bf16.mxu1 %v1732_v1 }
  0x2b   : > { %1428 = vmatpush3.bf16.msra.mxu0 %v1624_v15 }
  0x2c   : > { %1448 = vmatpush3.bf16.msra.mxu1 %v1625_v17  ;;  %1453 = vmatprep.subr.bf16.mxu0 %v1732_v1 }
  0x2d   : > { %1473 = vmatprep.subr.bf16.mxu1 %v1732_v1 }
  0x2e   : > { %1430 = vmatmul.mubr.bf16.vlgmr.msra.gmra.mrb[0].mxu0 %v1891_v18 }
  0x2f   : > { %1450 = vmatmul.mubr.bf16.vlgmr.msra.gmra.mrb[0].mxu1 %v1891_v18  ;;  %1454 = vmatpush3.bf16.msra.mxu0 %v1626_v19 }
  0x30   : > { %1474 = vmatpush3.bf16.msra.mxu1 %v1627_v20  ;;  %1455 = vmatprep.subr.bf16.mxu0 %v1732_v1 }
  0x31   : > { %1475 = vmatprep.subr.bf16.mxu1 %v1732_v1  ;;  %1469 = vmatprep.mubr.msk.bf16.mxu0 %vm1733_vm0, %v1732_v1 }
  0x32   : > { %1489 = vmatprep.mubr.msk.bf16.mxu1 %vm1733_vm0, %v1732_v1 }
  0x33   : > { %1456 = vmatpush3.bf16.msra.mxu0 %v1628_v21 }
  0x34   : > { %1476 = vmatpush3.bf16.msra.mxu1 %v1629_v22  ;;  %1457 = vmatprep.subr.bf16.mxu0 %v1732_v1 }
  0x35   : > { %1477 = vmatprep.subr.bf16.mxu1 %v1732_v1 }
  0x37   : > { %1458 = vmatpush3.bf16.msra.mxu0 %v1630_v23 }
  0x38   : > { %1478 = vmatpush3.bf16.msra.mxu1 %v1631_v24  ;;  %1459 = vmatprep.subr.bf16.mxu0 %v1732_v1 }
  0x39   : > { %1479 = vmatprep.subr.bf16.mxu1 %v1732_v1 }
  0x3b   : > { %1460 = vmatpush3.bf16.msra.mxu0 %v1632_v25 }
  0x3c   : > { %1480 = vmatpush3.bf16.msra.mxu1 %v1633_v26  ;;  %1461 = vmatprep.subr.bf16.mxu0 %v1732_v1 }
  0x3d   : > { %1481 = vmatprep.subr.bf16.mxu1 %v1732_v1 }
  0x3f   : > { %1462 = vmatpush3.bf16.msra.mxu0 %v1634_v27 }
  0x40   : > { %1482 = vmatpush3.bf16.msra.mxu1 %v1635_v28  ;;  %1463 = vmatprep.subr.bf16.mxu0 %v1732_v1 }
  0x41   : > { %1483 = vmatprep.subr.bf16.mxu1 %v1732_v1 }
  0x43   : > { %1464 = vmatpush3.bf16.msra.mxu0 %v1636_v29 }
  0x44   : > { %1484 = vmatpush3.bf16.msra.mxu1 %v1637_v30  ;;  %1465 = vmatprep.subr.bf16.mxu0 %v1732_v1 }
  0x45   : > { %1485 = vmatprep.subr.bf16.mxu1 %v1732_v1 }
  0x47   : > { %1466 = vmatpush3.bf16.msra.mxu0 %v1638_v31 }
  0x48   : > { %1486 = vmatpush3.bf16.msra.mxu1 %v1639_v32  ;;  %1467 = vmatprep.subr.bf16.mxu0 %v1732_v1 }
  0x49   : > { %1487 = vmatprep.subr.bf16.mxu1 %v1732_v1 }
  0x4b   : > { %1468 = vmatpush3.bf16.msra.mxu0 %v1640_v33 }
  0x4c   : > { %1488 = vmatpush3.bf16.msra.mxu1 %v1641_v34  ;;  %1493 = vmatprep.subr.bf16.mxu0 %v1732_v1 }
  0x4d   : > { %1513 = vmatprep.subr.bf16.mxu1 %v1732_v1 }
  0x4e   : > { %1470 = vmatmul.mubr.bf16.vlgmr.msra.gmra.mrb[4].mxu0 %v1891_v18 }
  0x4f   : > { %1490 = vmatmul.mubr.bf16.vlgmr.msra.gmra.mrb[4].mxu1 %v1891_v18  ;;  %1494 = vmatpush3.bf16.msra.mxu0 %v1642_v35 }
  0x50   : > { %1514 = vmatpush3.bf16.msra.mxu1 %v1643_v36  ;;  %1495 = vmatprep.subr.bf16.mxu0 %v1732_v1 }
  0x51   : > { %1515 = vmatprep.subr.bf16.mxu1 %v1732_v1  ;;  %1509 = vmatprep.mubr.msk.bf16.mxu0 %vm1733_vm0, %v1732_v1 }
  0x52   : > { %1529 = vmatprep.mubr.msk.bf16.mxu1 %vm1733_vm0, %v1732_v1 }
  0x53   : > { %1496 = vmatpush3.bf16.msra.mxu0 %v1644_v37 }
  0x54   : > { %1516 = vmatpush3.bf16.msra.mxu1 %v1645_v38  ;;  %1497 = vmatprep.subr.bf16.mxu0 %v1732_v1 }
  0x55   : > { %1517 = vmatprep.subr.bf16.mxu1 %v1732_v1 }
  0x57   : > { %1498 = vmatpush3.bf16.msra.mxu0 %v1646_v39 }
  0x58   : > { %1518 = vmatpush3.bf16.msra.mxu1 %v1647_v40  ;;  %1499 = vmatprep.subr.bf16.mxu0 %v1732_v1 }
  0x59   : > { %1519 = vmatprep.subr.bf16.mxu1 %v1732_v1 }
  0x5b   : > { %1500 = vmatpush3.bf16.msra.mxu0 %v1648_v41 }
  0x5c   : > { %1520 = vmatpush3.bf16.msra.mxu1 %v1649_v42  ;;  %1501 = vmatprep.subr.bf16.mxu0 %v1732_v1 }
  0x5d   : > { %1521 = vmatprep.subr.bf16.mxu1 %v1732_v1 }
  0x5f   : > { %1502 = vmatpush3.bf16.msra.mxu0 %v1650_v43 }
  0x60   : > { %1522 = vmatpush3.bf16.msra.mxu1 %v1651_v44  ;;  %1503 = vmatprep.subr.bf16.mxu0 %v1732_v1 }
  0x61   : > { %1523 = vmatprep.subr.bf16.mxu1 %v1732_v1 }
  0x63   : > { %1504 = vmatpush3.bf16.msra.mxu0 %v1652_v45 }
  0x64   : > { %1524 = vmatpush3.bf16.msra.mxu1 %v1653_v46  ;;  %1505 = vmatprep.subr.bf16.mxu0 %v1732_v1 }
  0x65   : > { %1525 = vmatprep.subr.bf16.mxu1 %v1732_v1 }
  0x67   : > { %1506 = vmatpush3.bf16.msra.mxu0 %v1654_v47 }
  0x68   : > { %1526 = vmatpush3.bf16.msra.mxu1 %v1655_v48  ;;  %1507 = vmatprep.subr.bf16.mxu0 %v1732_v1 }
  0x69   : > { %1527 = vmatprep.subr.bf16.mxu1 %v1732_v1 }
  0x6b   : > { %1508 = vmatpush3.bf16.msra.mxu0 %v1656_v49 }
  0x6c   : > { %1528 = vmatpush3.bf16.msra.mxu1 %v1657_v50  ;;  %1533 = vmatprep.subr.bf16.mxu0 %v1732_v1 }
  0x6d   : > { %1539 = vmatprep.subr.bf16.mxu1 %v1732_v1 }
  0x6e   : > { %1510 = vmatmul.mubr.bf16.vlgmr.msra.gmra.mrb[8].mxu0 %v1891_v18 }
  0x6f   : > { %1530 = vmatmul.mubr.bf16.vlgmr.msra.gmra.mrb[8].mxu1 %v1891_v18  ;;  %1535 = vmatprep.mubr.msk.bf16.mxu0 %vm1733_vm0, %v1732_v1 }
  0x70   : > { %1541 = vmatprep.mubr.msk.bf16.mxu1 %vm1733_vm0, %v1732_v1 }
 0x101   : > { %v364_v51 = vpop.f32.mrb[0].mxu0 }
 0x102   : > { %v1431_v52 = vpop.f32.mrb[1].mxu0  ;;  %v452_v53 = vpop.f32.mrb[0].mxu1  ;;  %v874_v8 = vmul.f32 0.25, %v364_v51 }
 0x103   : > { %v367_v54 = vpop.f32.mrb[2].mxu0  ;;  %v1451_v55 = vpop.f32.mrb[1].mxu1  ;;  %v875_v9 = vmul.f32 0.25, %v452_v53  ;;  %v1658_v52 = vld [vmem:[%s2125_s4] sm:$0xff]   ;;  %v1659_v53 = vld [vmem:[%s2125_s4 + $0x8] sm:$0xff]  }
 0x104   : > { %v1432_v56 = vpop.f32.mrb[3].mxu0  ;;  %v455_v57 = vpop.f32.mrb[2].mxu1  ;;  %v876_v10 = vpack.c.bf16 %v874_v8, %v874_v8 }
 0x105   : > { %v1452_v58 = vpop.f32.mrb[3].mxu1  ;;  %v877_v11 = vpack.c.bf16 %v875_v9, %v875_v9 }
 0x121   : > { %v572_v59 = vpop.f32.mrb[4].mxu0 }
 0x122   : > { %v878_v60 = vpack.c.bf16 %v572_v59, %v572_v59  ;;  %v660_v61 = vpop.f32.mrb[4].mxu1  ;;  %v1471_v62 = vpop.f32.mrb[5].mxu0 }
 0x123   : > { %v879_v63 = vpack.c.bf16 %v660_v61, %v660_v61  ;;  %v575_v0 = vpop.f32.mrb[6].mxu0  ;;  %v1491_v2 = vpop.f32.mrb[5].mxu1 }
 0x124   : > { %v887_v3 = vsel %vm882_vm1, %v878_v60, 0  ;;  %v1472_v4 = vpop.f32.mrb[7].mxu0  ;;  %v663_v5 = vpop.f32.mrb[6].mxu1 }
 0x125   : > { %v933_v6 = vsel %vm882_vm1, %v879_v63, 0  ;;  %v1492_v7 = vpop.f32.mrb[7].mxu1  ;;  %1534 = vmatpush3.bf16.xpose.msra.mxu0 %v887_v3  ;;  %v1342_v5 = vld [vmem:[%s2126_s5] ss:$0 sm:$0xff] }
 0x126   : > { %1540 = vmatpush3.bf16.xpose.msra.mxu1 %v933_v6  ;;  %1545 = vmatprep.subr.bf16.mxu0 %v1732_v1 }
 0x127   : > { %1551 = vmatprep.subr.bf16.mxu1 %v1732_v1 }
 0x12c   : > { %1536 = vmatmul.mubr.msk.bf16.vlgmr.msra.gmra.mrb[12].mxu0 %vm882_vm1, %v876_v10 }
 0x12d   : > { %1542 = vmatmul.mubr.msk.bf16.vlgmr.msra.gmra.mrb[12].mxu1 %vm882_vm1, %v877_v11  ;;  %1547 = vmatprep.mubr.msk.bf16.mxu0 %vm1733_vm0, %v1732_v1 }
 0x12e   : > { %1553 = vmatprep.mubr.msk.bf16.mxu1 %vm1733_vm0, %v1732_v1 }
 0x141   : > { %v780_v12 = vpop.f32.mrb[8].mxu0 }
 0x142   : > { %v868_v13 = vpop.f32.mrb[8].mxu1  ;;  %v880_v14 = vpack.c.bf16 %v780_v12, %v780_v12  ;;  %v1511_v15 = vpop.f32.mrb[9].mxu0 }
 0x143   : > { %v881_v16 = vpack.c.bf16 %v868_v13, %v868_v13  ;;  %v1531_v17 = vpop.f32.mrb[9].mxu1  ;;  %v783_v18 = vpop.f32.mrb[10].mxu0 }
 0x144   : > { %v871_v19 = vpop.f32.mrb[10].mxu1  ;;  %v1005_v20 = vsel %vm1003_vm2, %v880_v14, 0  ;;  %v1512_v21 = vpop.f32.mrb[11].mxu0 }
 0x145   : > { %v1051_v22 = vsel %vm1003_vm2, %v881_v16, 0  ;;  %v1532_v23 = vpop.f32.mrb[11].mxu1  ;;  %1546 = vmatpush3.bf16.msra.mxu0 %v1005_v20 }
 0x146   : > { %1552 = vmatpush3.bf16.msra.mxu1 %v1051_v22  ;;  %1557 = vmatprep.subr.bf16.mxu0 %v1732_v1 }
 0x147   : > { %1563 = vmatprep.subr.bf16.mxu1 %v1732_v1 }
 0x1ff   : > { %v923_v24 = vpop.f32.mrb[12].mxu0 }
 0x200   : > { %v969_v25 = vpop.f32.mrb[12].mxu1  ;;  %v1537_v26 = vpop.f32.mrb[13].mxu0  ;;  %v976_v27 = vsel %vm975_vm3, %v923_v24, -inf }
 0x201   : > { %v1543_v28 = vpop.f32.mrb[13].mxu1  ;;  %977 = vmax.xlane.f32.xlu0 %v976_v27  ;;  %v926_v29 = vpop.f32.mrb[14].mxu0  ;;  %v979_v33 = vsel %vm975_vm3, %v969_v25, -inf }
 0x202   : > { %v972_v30 = vpop.f32.mrb[14].mxu1  ;;  %v1538_v31 = vpop.f32.mrb[15].mxu0 }
 0x203   : > { %v1544_v32 = vpop.f32.mrb[15].mxu1 }
 0x205   : > { %980 = vmax.xlane.f32.xlu0 %v979_v33 }
 0x28e   : > { %v978_v34 = vpop.xlane.xlu0 %977 }
 0x28f   : > { %v982_v35 = vsub.f32 %v923_v24, %v978_v34 }
 0x291   : > { %v984_v36 = vmul.f32 1.442695, %v982_v35 }
 0x292   : > { %v981_v37 = vpop.xlane.xlu0 %980 }
 0x293   : > { %1660 = vpow2.f32 %v984_v36  ;;  %v983_v38 = vsub.f32 %v969_v25, %v981_v37 }
 0x295   : > { %v986_v39 = vmul.f32 1.442695, %v983_v38 }
 0x297   : > { %1662 = vpow2.f32 %v986_v39 }
 0x29d   : > { %v1661_v40 = vpop.eup %1660 }
 0x29e   : > { %v988_v41 = vsel %vm975_vm3, %v1661_v40, 0.0 }
 0x29f   : > { %989 = vadd.xlane.f32.xlu1 %v988_v41 }
 0x2a1   : > { %v1663_v42 = vpop.eup %1662 }
 0x2a2   : > { %v991_v43 = vsel %vm975_vm3, %v1663_v42, 0.0 }
 0x2a3   : > { %992 = vadd.xlane.f32.xlu1 %v991_v43 }
 0x32c   : > { %v990_v44 = vpop.xlane.xlu1 %989 }
 0x32d   : > { %1664 = vrcp.f32 %v990_v44 }
 0x330   : > { %v993_v45 = vpop.xlane.xlu1 %992 }
 0x331   : > { %1666 = vrcp.f32 %v993_v45 }
 0x337   : > { %v1665_v46 = vpop.eup %1664 }
 0x338   : > { %v996_v47 = vmul.f32 %v1665_v46, %v1661_v40 }
 0x33a   : > { %v998_v48 = vpack.c.bf16 %v996_v47, %v996_v47 }
 0x33b   : > { %v1667_v49 = vpop.eup %1666 }
 0x33c   : > { %v997_v50 = vmul.f32 %v1667_v49, %v1663_v42  ;;  %1548 = vmatmul.mubr.msk.bf16.vlgmr.msra.gmra.mrb[16].mxu0 %vm975_vm3, %v998_v48 }
 0x33d   : > { %1559 = vmatprep.mubr.msk.bf16.mxu0 %vm1733_vm0, %v1732_v1  ;;  %1558 = vmatpush3.bf16.msra.mxu0 %v1658_v52 }
 0x33e   : > { %v999_v51 = vpack.c.bf16 %v997_v50, %v997_v50 }
 0x340   : > { %1554 = vmatmul.mubr.msk.bf16.vlgmr.msra.gmra.mrb[16].mxu1 %vm975_vm3, %v999_v51 }
 0x341   : > { %1565 = vmatprep.mubr.msk.bf16.mxu1 %vm1733_vm0, %v1732_v1  ;;  %1564 = vmatpush3.bf16.msra.mxu1 %v1659_v53 }
 0x40f   : > { %v1041_v54 = vpop.f32.mrb[16].mxu0 }
 0x410   : > { %v1093_v55 = vpack.c.bf16 %v1041_v54, %v1041_v54  ;;  %v1549_v56 = vpop.f32.mrb[17].mxu0 }
 0x411   : > { %v1044_v57 = vpop.f32.mrb[18].mxu0 }
 0x412   : > { %v1550_v58 = vpop.f32.mrb[19].mxu0  ;;  %1560 = vmatmul.mubr.msk.bf16.vlgmr.msra.gmra.mrb[20].mxu0 %vm882_vm1, %v1093_v55 }
 0x413   : > { %v1087_v1 = vpop.f32.mrb[16].mxu1 }
 0x414   : > { %v1094_v59 = vpack.c.bf16 %v1087_v1, %v1087_v1  ;;  %v1555_v60 = vpop.f32.mrb[17].mxu1 }
 0x415   : > { %v1090_v61 = vpop.f32.mrb[18].mxu1 }
 0x416   : > { %v1556_v62 = vpop.f32.mrb[19].mxu1  ;;  %1566 = vmatmul.mubr.msk.bf16.vlgmr.msra.gmra.mrb[20].mxu1 %vm882_vm1, %v1094_v59 }
 0x4e5   : > { %v1142_v63 = vpop.f32.mrb[20].mxu0 }
 0x4e6   : > { %v1561_v0 = vpop.f32.mrb[21].mxu0 }
 0x4e7   : > { %v1145_v2 = vpop.f32.mrb[22].mxu0 }
 0x4e8   : > { %v1562_v3 = vpop.f32.mrb[23].mxu0 }
 0x4e9   : > { %v1191_v4 = vpop.f32.mrb[20].mxu1 }
 0x4ea   : > { %v1197_v6 = vadd.f32 %v1191_v4, %v1142_v63  ;;  %v1567_v7 = vpop.f32.mrb[21].mxu1 }
 0x4eb   : > { %v1194_v8 = vpop.f32.mrb[22].mxu1 }
 0x4ec   : > { %v1205_v9 = vadd.f32 %v1342_v5, %v1197_v6  ;;  %v1568_v10 = vpop.f32.mrb[23].mxu1 }
 0x4ee   : > { %1206 = vst [vmem:[%s242_s14] sm:$0xff] %v1205_v9 }
 0x4ef   : > { %1681 = shalt.err (!%p1678_p3)
}
 0x4f0   : > { %s1682_s29 = scalar_lea.hbm %s2079_s18, 128  ;;  %s1686_s11 = scalar_lea.hbm %s2127_s6, 256 }
 0x4f1   : > { %p1683_p4 = scmp.ne.s32.totalorder %s2079_s18, %s1682_s29  ;;  %p1687_p9 = scmp.lt.u32.totalorder %s2079_s18, %s2127_s6 }
 0x4f2   : > { %p1688_p10 = scmp.lt.u32.totalorder %s1686_s11, %s1682_s29  ;;  %p1690_p12 = scmp.lt.u32.totalorder %s1682_s29, %s2079_s18 }
 0x4f3   : > { %p1684_p7 = pnand %p1683_p4, %p1808_p5 }
 0x4f4   : > { %p1689_p11 = por %p1688_p10, %p1687_p9 }
 0x4f5   : > { %p1685_p8 = pneg %p1684_p7 }
 0x4f6   : > { %p1691_p13 = por %p1690_p12, %p1689_p11 }
 0x4f8   : > { %p1692_p0 = pnand %p1691_p13, %p1685_p8 }
 0x4fa   : > { %1695 = shalt.err (!%p1692_p0)
}
 0x4fb   : > { %1569 = dma.vmem_to_hbm [thread:$0]  (%p1808_p5), %s2081_s15, 128, %s2079_s18, %s1208_s19  }
 0x4fc PF: > { %p1575_p1 = scmp.ge.s32.totalorder %s1730_s24, 2  ;;  %s1233_s14 = sand.u32 1, %s1718_s21  }
 0x4fd   : > { %s1234_s16 = scalar_lea.sflag [#allocation3], %s1233_s14 }
 0x4fe   : > { %p1572_p2 = pnand %p1575_p1, %p1812_p6 }
 0x500   : > { %1713 = dma.done.wait (!%p1572_p2), %s1234_s16, 128  }
 0x501   : > { %1715 = vsyncadd (!%p1572_p2), %s1234_s16, 4294967168  ;;  %p16_p3 = scmp.ge.s32.totalorder %s1795_s27, 4   ;;  %s2130_s21 = smov %s1722_s22 }
 0x502   : > { %s2131_s22 = smov %s1726_s23  ;;  %s2132_s23 = smov %s1806_s30 }
 0x503   : > { %s2133_s24 = smov %s1795_s27  ;;  %18 = sbr.rel (!%p16_p3) target bundleno = 3 (0x3), region = 79 }
 0x50a   :  { %1239 = vsyncpa [#allocation3], 1 }
 0x50b   :  { %1241 = vsyncpa [#allocation3 + $0x1], 1 }

</bundles_post_ra>
